<compile_context>
chip_gen: v7x
topology: tpu7x:2x2x1
jax: 0.10.0
libtpu: 0.0.40
codegen_flags: <defaults>
</compile_context>

<pallas_src>
import functools

import jax
import jax.numpy as jnp
from jax import lax
from jax.experimental import pallas as pl
from jax.experimental.pallas import tpu as pltpu

BN_EPS = 1e-5


def _round_up(x, m):
    return (x + m - 1) // m * m


def _backbone_head_kernel(x_ref, w_ref, gf_ref, cls_ref, *, inv_hw):
    """Fused GAP + BatchNorm1d(affine=False, train) + Linear(no bias).

    Grid = (C tiles [parallel], HW tiles [arbitrary reduction]).

    x_ref:   (B, hw_tile, c_tile) f32   feature slab, channels on lanes
    w_ref:   (c_tile, NC_pad)     bf16  classifier weight slice (transposed)
    gf_ref:  (B, c_tile)          f32   GAP accumulator / global_feat output
    cls_ref: (1, B, NC_pad)       f32   partial logits for this C tile
    """
    hi = pl.program_id(1)

    # Partial spatial sum for this HW tile (sublane reduce, lanes = channels).
    partial = jnp.sum(x_ref[...], axis=1)                          # (B, c_tile)

    @pl.when(hi == 0)
    def _first():
        gf_ref[...] = partial

    @pl.when(hi > 0)
    def _accum():
        gf_ref[...] += partial

    @pl.when(hi == pl.num_programs(1) - 1)
    def _finalize():
        # --- nn.functional.avg_pool2d(x, x.shape[2:4]).view(B, -1) ---
        global_feat = gf_ref[...] * inv_hw                         # (B, c_tile)
        gf_ref[...] = global_feat

        # --- BatchNorm1d(in_planes, affine=False), training mode ---
        # Per-channel stats over the FULL batch (B is un-tiled), biased var.
        mu = jnp.mean(global_feat, axis=0, keepdims=True)          # (1, c_tile)
        var = jnp.mean((global_feat - mu) ** 2, axis=0, keepdims=True)
        feat = (global_feat - mu) * lax.rsqrt(var + BN_EPS)        # (B, c_tile)

        # --- classifier: Linear(in_planes, num_classes, bias=False) ---
        # Partial product for this C tile; bf16 MXU inputs, f32 accumulation.
        cls_ref[0] = jnp.dot(feat.astype(jnp.bfloat16), w_ref[...],
                             preferred_element_type=jnp.float32)   # (B, NC_pad)


def backbone_forward(feat_map, classifier_weight, *, c_tile=None, hw_tile=None):
    """Training-mode Backbone head.

    feat_map:          (B, C, H, W) NCHW float32 (output of self.base)
    classifier_weight: (num_classes, C) float32 (PyTorch Linear layout)
    returns (cls_score, global_feat) as in training-mode Backbone.forward.
    """
    B, C, H, W = feat_map.shape
    NC = classifier_weight.shape[0]
    HW = H * W

    # --- tiling / padding (everything lane-dense, multiples of 128) ---
    C_pad = _round_up(C, 128)
    if c_tile is None:
        c_tile = min(C_pad, 512)
        while C_pad % c_tile:
            c_tile -= 128
    assert c_tile % 128 == 0 and C_pad % c_tile == 0

    if hw_tile is None:
        # Largest multiple of 8 whose (B, hw_tile, c_tile) f32 block fits a
        # ~6 MiB budget (double-buffered by the pipeline); covers the whole
        # spatial extent in one step for typical reid feature maps.
        budget = 6 * 1024 * 1024
        max_hw = max(8, (budget // (B * c_tile * 4)) // 8 * 8)
        hw_tile = min(_round_up(HW, 8), max_hw)
    assert hw_tile % 8 == 0
    HW_pad = _round_up(HW, hw_tile)
    NC_pad = _round_up(NC, 128)
    n_ct = C_pad // c_tile
    n_ht = HW_pad // hw_tile

    # Channels-on-lanes layout.  In a full pipeline the ResNet base would emit
    # NHWC directly and this transpose/pad would disappear (layout plumbing).
    x = jnp.transpose(feat_map.astype(jnp.float32), (0, 2, 3, 1)).reshape(B, HW, C)
    if HW_pad != HW or C_pad != C:
        x = jnp.pad(x, ((0, 0), (0, HW_pad - HW), (0, C_pad - C)))

    # Classifier weight: transpose to (C, NC), pad, cast to bf16 for the MXU.
    w = classifier_weight.astype(jnp.float32).T
    if C_pad != C or NC_pad != NC:
        w = jnp.pad(w, ((0, C_pad - C), (0, NC_pad - NC)))
    w = w.astype(jnp.bfloat16)

    # Scoped VMEM: double-buffered blocks + headroom, capped under v7x's 64 MiB.
    x_block = B * hw_tile * c_tile * 4
    w_block = c_tile * NC_pad * 2
    out_blocks = B * c_tile * 4 + B * NC_pad * 4
    vmem_limit = min(max(4 * (x_block + w_block + out_blocks), 32 * 1024 * 1024),
                     56 * 1024 * 1024)

    gf_pad, cls_part = pl.pallas_call(
        functools.partial(_backbone_head_kernel, inv_hw=1.0 / HW),
        out_shape=(
            jax.ShapeDtypeStruct((B, C_pad), jnp.float32),          # global_feat
            jax.ShapeDtypeStruct((n_ct, B, NC_pad), jnp.float32),   # partial logits
        ),
        grid_spec=pltpu.PrefetchScalarGridSpec(
            num_scalar_prefetch=0,
            grid=(n_ct, n_ht),
            in_specs=[
                pl.BlockSpec((B, hw_tile, c_tile), lambda ci, hi: (0, hi, ci)),
                pl.BlockSpec((c_tile, NC_pad), lambda ci, hi: (ci, 0)),
            ],
            out_specs=(
                pl.BlockSpec((B, c_tile), lambda ci, hi: (0, ci)),
                pl.BlockSpec((1, B, NC_pad), lambda ci, hi: (ci, 0, 0)),
            ),
        ),
        compiler_params=pltpu.CompilerParams(
            dimension_semantics=("parallel", "arbitrary"),
            vmem_limit_bytes=vmem_limit,
        ),
    )(x, w)

    cls_score = jnp.sum(cls_part, axis=0)[:, :NC]   # tiny cross-C-tile reduce
    global_feat = gf_pad[:, :C]
    return cls_score, global_feat


def reference_forward(feat_map, classifier_weight):
    """Pure-JAX reference of the same training-mode forward (f32 throughout)."""
    B, C, H, W = feat_map.shape
    gf = jnp.mean(feat_map.reshape(B, C, H * W), axis=-1)
    mu = jnp.mean(gf, axis=0, keepdims=True)
    var = jnp.mean((gf - mu) ** 2, axis=0, keepdims=True)
    feat = (gf - mu) / jnp.sqrt(var + BN_EPS)
    cls = feat @ classifier_weight.T
    return cls, gf


if __name__ == "__main__":
    # Small shapes consistent with the module (real model: B~64, C=2048,
    # HW~49-128, NC~751).  Explicit small tiles exercise both the multi-step
    # GAP accumulation (HW grid) and the cross-C-tile partial-logit sum.
    B, C, H, W = 2, 256, 8, 8
    NUM_CLASSES = 16

    key = jax.random.PRNGKey(0)
    k_x, k_w = jax.random.split(key)

    # Stand-in for self.base(x) output feature map.
    feat_map = jax.random.normal(k_x, (B, C, H, W), dtype=jnp.float32)

    # weights_init_classifier: nn.init.normal_(weight, std=0.001), no bias.
    classifier_weight = 0.001 * jax.random.normal(
        k_w, (NUM_CLASSES, C), dtype=jnp.float32)

    cls_ref, gf_ref = reference_forward(feat_map, classifier_weight)

    # Run 1: explicit small tiles -> multi HW steps + multiple C tiles.
    cls_score, global_feat = backbone_forward(
        feat_map, classifier_weight, c_tile=128, hw_tile=16)
    jax.block_until_ready((cls_score, global_feat))
    assert cls_score.shape == (B, NUM_CLASSES)
    assert global_feat.shape == (B, C)
    assert jnp.allclose(global_feat, gf_ref, atol=1e-5, rtol=1e-5)
    # Classifier matmul runs bf16 on the MXU (f32 accumulation) -> looser tol.
    assert jnp.allclose(cls_score, cls_ref, atol=1e-3, rtol=2e-2)

    # Run 2: default adaptive tiling (single HW step, single C tile here).
    cls_score2, global_feat2 = backbone_forward(feat_map, classifier_weight)
    jax.block_until_ready((cls_score2, global_feat2))
    assert jnp.allclose(global_feat2, gf_ref, atol=1e-5, rtol=1e-5)
    assert jnp.allclose(cls_score2, cls_ref, atol=1e-3, rtol=2e-2)

    print("KERNEL_OK")
</pallas_src>

<mosaic_0001>
module attributes {stable_mosaic.version = 11 : i64} {
  func.func @_backbone_head_kernel(%arg0: i32, %arg1: i32, %arg2: memref<2x16x128xf32, #tpu.memory_space<vmem>>, %arg3: memref<128x128xbf16, #tpu.memory_space<vmem>>, %arg4: memref<2x128xf32, #tpu.memory_space<vmem>>, %arg5: memref<1x2x128xf32, #tpu.memory_space<vmem>>) attributes {dimension_semantics = [#tpu.dimension_semantics<parallel>, #tpu.dimension_semantics<arbitrary>], iteration_bounds = array<i64: 2, 4>, scalar_prefetch = 0 : i64, scratch_operands = 0 : i64, tpu.core_type = #tpu.core_type<tc>, window_params = [{transform_indices = @transform_0, window_bounds = array<i64: 2, 16, 128>}, {transform_indices = @transform_1, window_bounds = array<i64: 128, 128>}, {transform_indices = @transform_2, window_bounds = array<i64: 2, 128>}, {transform_indices = @transform_3, window_bounds = array<i64: 1, 2, 128>}]} {
    %c0 = arith.constant 0 : index
    %c0_0 = arith.constant 0 : index
    %c0_1 = arith.constant 0 : index
    %0 = vector.load %arg2[%c0, %c0_0, %c0_1] : memref<2x16x128xf32, #tpu.memory_space<vmem>>, vector<2x16x128xf32>
    %cst = arith.constant dense<0.000000e+00> : vector<2x128xf32>
    %1 = vector.multi_reduction <add>, %0, %cst [1] : vector<2x16x128xf32> to vector<2x128xf32>
    %c0_i32 = arith.constant 0 : i32
    %2 = arith.cmpi eq, %arg1, %c0_i32 : i32
    %3 = arith.extui %2 : i1 to i32
    %c0_i32_2 = arith.constant 0 : i32
    %4 = arith.cmpi ne, %3, %c0_i32_2 : i32
    scf.if %4 {
      %c0_6 = arith.constant 0 : index
      %c0_7 = arith.constant 0 : index
      %11 = vector.load %arg4[%c0_6, %c0_7] : memref<2x128xf32, #tpu.memory_space<vmem>>, vector<2x128xf32>
      tpu.vector_store %arg4[%c0_6, %c0_7], %1 {strides = array<i32>} : memref<2x128xf32, #tpu.memory_space<vmem>>, vector<2x128xf32>,
    } else {
    }
    %c0_i32_3 = arith.constant 0 : i32
    %5 = arith.cmpi sgt, %arg1, %c0_i32_3 : i32
    %6 = arith.extui %5 : i1 to i32
    %c0_i32_4 = arith.constant 0 : i32
    %7 = arith.cmpi ne, %6, %c0_i32_4 : i32
    scf.if %7 {
      %c0_6 = arith.constant 0 : index
      %c0_7 = arith.constant 0 : index
      %11 = vector.load %arg4[%c0_6, %c0_7] : memref<2x128xf32, #tpu.memory_space<vmem>>, vector<2x128xf32>
      %12 = arith.addf %11, %1 : vector<2x128xf32>
      %c0_8 = arith.constant 0 : index
      %c0_9 = arith.constant 0 : index
      %13 = vector.load %arg4[%c0_8, %c0_9] : memref<2x128xf32, #tpu.memory_space<vmem>>, vector<2x128xf32>
      tpu.vector_store %arg4[%c0_8, %c0_9], %12 {strides = array<i32>} : memref<2x128xf32, #tpu.memory_space<vmem>>, vector<2x128xf32>,
    } else {
    }
    %c3_i32 = arith.constant 3 : i32
    %8 = arith.cmpi eq, %arg1, %c3_i32 : i32
    %9 = arith.extui %8 : i1 to i32
    %c0_i32_5 = arith.constant 0 : i32
    %10 = arith.cmpi ne, %9, %c0_i32_5 : i32
    scf.if %10 {
      %c0_6 = arith.constant 0 : index
      %c0_7 = arith.constant 0 : index
      %11 = vector.load %arg4[%c0_6, %c0_7] : memref<2x128xf32, #tpu.memory_space<vmem>>, vector<2x128xf32>
      %cst_8 = arith.constant 1.562500e-02 : f32
      %12 = vector.broadcast %cst_8 : f32 to vector<2x128xf32>
      %13 = arith.mulf %11, %12 : vector<2x128xf32>
      %c0_9 = arith.constant 0 : index
      %c0_10 = arith.constant 0 : index
      %14 = vector.load %arg4[%c0_9, %c0_10] : memref<2x128xf32, #tpu.memory_space<vmem>>, vector<2x128xf32>
      tpu.vector_store %arg4[%c0_9, %c0_10], %13 {strides = array<i32>} : memref<2x128xf32, #tpu.memory_space<vmem>>, vector<2x128xf32>,
      %cst_11 = arith.constant dense<0.000000e+00> : vector<128xf32>
      %15 = vector.multi_reduction <add>, %13, %cst_11 [0] : vector<2x128xf32> to vector<128xf32>
      %16 = vector.shape_cast %15 : vector<128xf32> to vector<1x128xf32>
      %cst_12 = arith.constant 2.000000e+00 : f32
      %17 = vector.broadcast %cst_12 : f32 to vector<1x128xf32>
      %18 = arith.divf %16, %17 : vector<1x128xf32>
      %19 = vector.broadcast %18 : vector<1x128xf32> to vector<2x128xf32>
      %20 = arith.subf %13, %19 : vector<2x128xf32>
      %21 = arith.mulf %20, %20 : vector<2x128xf32>
      %cst_13 = arith.constant dense<0.000000e+00> : vector<128xf32>
      %22 = vector.multi_reduction <add>, %21, %cst_13 [0] : vector<2x128xf32> to vector<128xf32>
      %23 = vector.shape_cast %22 : vector<128xf32> to vector<1x128xf32>
      %cst_14 = arith.constant 2.000000e+00 : f32
      %24 = vector.broadcast %cst_14 : f32 to vector<1x128xf32>
      %25 = arith.divf %23, %24 : vector<1x128xf32>
      %26 = vector.broadcast %18 : vector<1x128xf32> to vector<2x128xf32>
      %27 = arith.subf %13, %26 : vector<2x128xf32>
      %cst_15 = arith.constant 9.99999974E-6 : f32
      %28 = vector.broadcast %cst_15 : f32 to vector<1x128xf32>
      %29 = arith.addf %25, %28 : vector<1x128xf32>
      %30 = math.rsqrt %29 : vector<1x128xf32>
      %31 = vector.broadcast %30 : vector<1x128xf32> to vector<2x128xf32>
      %32 = arith.mulf %27, %31 : vector<2x128xf32>
      %33 = arith.truncf %32 : vector<2x128xf32> to vector<2x128xbf16>
      %c0_16 = arith.constant 0 : index
      %c0_17 = arith.constant 0 : index
      %34 = vector.load %arg3[%c0_16, %c0_17] : memref<128x128xbf16, #tpu.memory_space<vmem>>, vector<128x128xbf16>
      %cst_18 = arith.constant dense<0.000000e+00> : vector<2x128xf32>
      %35 = tpu.matmul %33, %34, %cst_18 {dimension_numbers = #tpu.dot_dimension_numbers<[1], [0], [0], [1], [0, 0, 1, 1], [], []>} : vector<2x128xbf16>, vector<128x128xbf16>, vector<2x128xf32> -> vector<2x128xf32>
      %c0_19 = arith.constant 0 : index
      %c0_20 = arith.constant 0 : index
      %c0_21 = arith.constant 0 : index
      %36 = vector.load %arg5[%c0_19, %c0_20, %c0_21] : memref<1x2x128xf32, #tpu.memory_space<vmem>>, vector<1x2x128xf32>
      %37 = vector.shape_cast %36 : vector<1x2x128xf32> to vector<2x128xf32>
      %38 = vector.shape_cast %35 : vector<2x128xf32> to vector<1x2x128xf32>
      tpu.vector_store %arg5[%c0_19, %c0_20, %c0_21], %38 {strides = array<i32>} : memref<1x2x128xf32, #tpu.memory_space<vmem>>, vector<1x2x128xf32>,
    } else {
    }
    return
  }
  func.func @transform_0(%arg0: i32, %arg1: i32) -> (i32, i32, i32) {
    %c0_i32 = arith.constant 0 : i32
    %c0_i32_0 = arith.constant 0 : i32
    return %c0_i32, %arg1, %arg0 : i32, i32, i32
  }
  func.func @transform_1(%arg0: i32, %arg1: i32) -> (i32, i32) {
    %c0_i32 = arith.constant 0 : i32
    %c0_i32_0 = arith.constant 0 : i32
    return %arg0, %c0_i32 : i32, i32
  }
  func.func @transform_2(%arg0: i32, %arg1: i32) -> (i32, i32) {
    %c0_i32 = arith.constant 0 : i32
    %c0_i32_0 = arith.constant 0 : i32
    return %c0_i32, %arg0 : i32, i32
  }
  func.func @transform_3(%arg0: i32, %arg1: i32) -> (i32, i32, i32) {
    %c0_i32 = arith.constant 0 : i32
    %c0_i32_0 = arith.constant 0 : i32
    %c0_i32_1 = arith.constant 0 : i32
    return %arg0, %c0_i32, %c0_i32_0 : i32, i32, i32
  }
}

</mosaic_0001>

<bundles_post_ra>
// kernel: tpu_custom_call.1
= control target key start
LH: loop header
LB: loop body
LE: loop exit
PB: predicated region body
PF: predicated region fallthrough
CT: control target
= control target key end

     0   :  { %s1354_s0 = inlined_call_operand.hbm [shape: f32[2,64,256], index: 0, kind: input, shape index: {}]   ;;  %s1355_s1 = inlined_call_operand.hbm [shape: bf16[256,128], index: 1, kind: input, shape index: {}]   ;;  %s1356_s2 = inlined_call_operand.hbm [shape: f32[2,256], index: 2, kind: output, shape index: {0}]   ;;  %s1357_s3 = inlined_call_operand.hbm [shape: f32[2,2,128], index: 3, kind: output, shape index: {1}]  }
   0x1   :  { %1366 = sst [smem:[#allocation25_spill]] %s1354_s0 }
   0x2   :  { %9 = vsyncpa [#allocation3], 0 }
   0x3   :  { %11 = vsyncpa [#allocation3 + $0x1], 0 }
   0x4   :  { %12 = vsyncpa [#allocation6], 0 }
   0x5   :  { %14 = vsyncpa [#allocation6 + $0x1], 0 }
   0x6   :  { %15 = vsyncpa [#allocation4], 0 }
   0x7   :  { %17 = vsyncpa [#allocation4 + $0x1], 0 }
   0x8   :  { %18 = vsyncpa [#allocation9], 0 }
   0x9   :  { %20 = vsyncpa [#allocation9 + $0x1], 0  ;;  %s1048_s12 = smov 0   ;;  %s1050_s13 = smov 0  }
   0xa   :  { %s1052_s14 = smov 0   ;;  %s1054_s15 = smov 0  }
   0xb   :  { %s1056_s16 = smov 0   ;;  %s1058_s17 = smov 0  }
   0xc   :  { %s1060_s18 = smov 0   ;;  %s1062_s19 = smov 0  }
   0xd   :  { %s1064_s20 = smov 0   ;;  %s1066_s21 = smov 0  }
   0xe   :  { %s1068_s22 = smov 0  }
   0xf LB: > { %1367 = sst [smem:[#allocation17_spill]] %s973_s12  ;;  %s630_s23 = sadd.s32 4294967295, %s1013_s22   ;;  %s1013_s22 = sphi %s1068_s22, %s26_s22   ;;  %s1009_s21 = sphi %s1066_s21, %s1400_s21   ;;  %s1005_s20 = sphi %s1064_s20, %s1392_s20   ;;  %s1001_s19 = sphi %s1062_s19, %s1399_s19   ;;  %s997_s18 = sphi %s1060_s18, %s1391_s18   ;;  %s993_s17 = sphi %s1058_s17, %s1390_s17   ;;  %s989_s16 = sphi %s1056_s16, %s1398_s16   ;;  %s985_s15 = sphi %s1054_s15, %s1397_s15   ;;  %s981_s14 = sphi %s1052_s14, %s1396_s14   ;;  %s977_s13 = sphi %s1050_s13, %s1395_s13   ;;  %s973_s12 = sphi %s1048_s12, %s1394_s12  }
  0x10   : > { %1368 = sst [smem:[#allocation18_spill]] %s993_s17  ;;  %s631_s24 = sadd.s32 4294967294, %s1013_s22  }
  0x11   : > { %1369 = sst [smem:[#allocation19_spill]] %s1005_s20  ;;  %s35_s25 = sadd.s32 1, %s1005_s20 }
  0x12   : > { %s38_s26 = sadd.s32 1, %s1009_s21  ;;  %p36_p0 = scmp.ge.s32.totalorder %s35_s25, 4 }
  0x13   : > { %s47_s27 = sadd.s32 1, %s993_s17  ;;  %p54_p1 = scmp.ne.s32.totalorder %s993_s17, %s989_s16 }
  0x14   : > { %p55_p2 = scmp.eq.s32.totalorder %s1013_s22, 0  ;;  %s1402_s25 = smov (%p36_p0, %s35_s25), 0 }
  0x15   : > { %1370 = sst [smem:[#allocation20_spill]] %s1402_s25  ;;  %s1404_s26 = smov (!%p36_p0, %s38_s26), %s1009_s21 }
  0x16   : > { %s42_s28 = ssub.s32 %s1005_s20, %s1402_s25  ;;  %p1116_p3 = por %p55_p2, %p54_p1 }
  0x17   : > { %p40_p4 = scmp.ge.s32.totalorder %s1404_s26, 2  ;;  %p60_p5 = scmp.ne.s32.totalorder %s989_s16, %s985_s15 }
  0x18   : > { %p1121_p6 = scmp.eq.s32.totalorder %s630_s23, 0  ;;  %s73_s4 = sadd.s32 1, %s981_s14 }
  0x19   : > { %s1406_s26 = smov (%p40_p4, %s1404_s26), 0  ;;  %p80_p8 = scmp.ne.s32.totalorder %s981_s14, %s977_s13 }
  0x1a   : > { %1373 = sst [smem:[#allocation21_spill]] %s1406_s26  ;;  %p1130_p7 = por %p1121_p6, %p60_p5 }
  0x1b   : > { %s43_s6 = ssub.s32 %s1009_s21, %s1406_s26  ;;  %p86_p9 = scmp.ne.s32.totalorder %s977_s13, %s973_s12 }
  0x1c   : > { %s44_s7 = sor.u32 %s43_s6, %s42_s28  ;;  %p71_p10 = scmp.eq.s32.totalorder %s43_s6, 0 }
  0x1d   : > { %p45_p11 = scmp.eq.s32.totalorder %s44_s7, 0  ;;  %p1142_p12 = por %p80_p8, %p55_p2 }
  0x1e   : > { %s1147_s9 = scalar_select %p71_p10, %s981_s14, %s73_s4  }
  0x1f   : > { %s1150_s10 = scalar_select %p45_p11, %s993_s17, %s47_s27  }
  0x20   : > { %1376 = sst [smem:[#allocation22_spill]] %s1147_s9  ;;  %p1154_p13 = por %p86_p9, %p1121_p6 }
  0x21   : > { %1377 = sst [smem:[#allocation23_spill]] %s1150_s10  ;;  %p110_p0 = scmp.eq.s32.totalorder %s630_s23, 7 }
  0x22   : > { %s1378_s11 = scalar_select %p1154_p13, 1, 0 }
  0x23   : > { %p116_p1 = scmp.eq.s32.totalorder %s631_s24, 7  ;;  %p1158_p4 = por %p110_p0, %p80_p8 }
  0x24   : > { %p633_p2 = scmp.ge.s32.totalorder %s1013_s22, 8 }
  0x25   : > { %s1379_s15 = scalar_select %p1158_p4, 1, 0 }
  0x26   : > { %p1162_p5 = por %p116_p1, %p86_p9  ;;  %158 = sbr.rel (%p633_p2) target bundleno = 86 (0x56), region = 16 }
  0x28   : > { %s1380_s28 = scalar_select %p1162_p5, 1, 0 }
  0x2a   : > { %1381 = sst [smem:[#allocation24_spill]] %s1380_s28 }
  0x2d   : > { %s162_s23 = sand.u32 1, %s993_s17   ;;  %s665_s24 = sshll.u32 %s1005_s20, 2 }
  0x2e   : > { %s634_s27 = sshll.u32 %s162_s23, 5  ;;  %s172_s30 = sadd.s32 %s1009_s21, %s665_s24 }
  0x2f   : > { %s637_s4 = sshll.u32 %s172_s30, 7  ;;  %s1382_s0 = sld [smem:[#allocation25_spill]] }
  0x30   : > { %s166_s25 = scalar_lea.vmem [#allocation2], %s634_s27  ;;  %s1015_s12 = smov 2048  }
  0x31   : > { %s187_s10 = sshll.u32 %s166_s25, 4  ;;  %697 = sst [smem:[#allocation11]] (%p1116_p3), %s1015_s12  ;;  %s188_s10 = int_to_ptr.vmem [resolvable:$true] %s187_s10 }
  0x32   : > { %s696_s9 = scalar_select %p1116_p3, [#allocation0], [#allocation12] }
  0x33   : > { %s1016_s17 = smov 256   ;;  %s1017_s24 = smov 2  }
  0x34   : > { %s179_s28 = sld [smem:[%s696_s9]]   ;;  %s1018_s30 = smov 128  }
  0x35   : > { %s174_s26 = scalar_lea.hbm %s1382_s0, %s637_s4  ;;  %698 = sst [smem:[#allocation11 + $0x1]] (%p1116_p3), %s1016_s17 }
  0x36   : > { %699 = sst [smem:[#allocation11 + $0x2]] (%p1116_p3), %s1017_s24  ;;  %s1019_s25 = smov 8  }
  0x37   : > { %700 = sst [smem:[#allocation11 + $0x3]] (%p1116_p3), %s1016_s17  ;;  %s163_s4 = scalar_lea.sflag [#allocation3], %s162_s23 }
  0x38   : > { %701 = sst [smem:[#allocation11 + $0x4]] (%p1116_p3), %s1018_s30  ;;  %s1020_s6 = smov [#allocation10]  }
  0x39   : > { %702 = sst [smem:[#allocation11 + $0x5]] (%p1116_p3), %s1019_s25  ;;  %s210_s12 = sand.u32 1, %s981_s14  }
  0x3a   : > { %s638_s9 = sshll.u32 %s179_s28, 26  ;;  %s666_s7 = sshll.u32 %s1009_s21, 10 }
  0x3b   : > { %s639_s27 = sadd.s32 134217728, %s638_s9  ;;  %s640_s24 = sshll.u32 %s210_s12, 6 }
  0x3c   : > { %703 = dma.general (%p1116_p3), %s174_s26, 512, %s188_s10, %s163_s4, %s1020_s6, [#allocation11], %s639_s27, 0  }
  0x3d   : > { %s1194_s20 = scalar_lea.hbm %s1355_s1, %s666_s7  ;;  %s214_s28 = scalar_lea.vmem [#allocation5], %s640_s24 }
  0x3e   : > { %s221_s23 = sshll.u32 %s214_s28, 4  ;;  %s1198_s26 = scalar_lea.sflag [#allocation6], %s210_s12  ;;  %s1196_s23 = int_to_ptr.vmem [resolvable:$true] %s221_s23 }
  0x3f   : > { %s827_s29 = scalar_lea.hbm %s1194_s20, 1024  ;;  %s831_s0 = scalar_lea.hbm %s1355_s1, 2048 }
  0x40   : > { %p828_p3 = scmp.ne.s32.totalorder %s1194_s20, %s827_s29  ;;  %p832_p9 = scmp.lt.u32.totalorder %s1194_s20, %s1355_s1 }
  0x41   : > { %p833_p10 = scmp.lt.u32.totalorder %s831_s0, %s827_s29  ;;  %p835_p0 = scmp.lt.u32.totalorder %s827_s29, %s1194_s20 }
  0x42   : > { %p829_p6 = pnand %p828_p3, %p1142_p12 }
  0x43   : > { %p834_p11 = por %p833_p10, %p832_p9 }
  0x44   : > { %p830_p8 = pneg %p829_p6 }
  0x45   : > { %p836_p1 = por %p835_p0, %p834_p11 }
  0x47   : > { %p837_p2 = pnand %p836_p1, %p830_p8 }
  0x49   : > { %840 = shalt.err (!%p837_p2)
}
  0x4a   : > { %s841_s27 = scalar_lea.vmem %s1196_s23, 1024  ;;  %s1021_s4 = smov [#allocation5]  }
  0x4b   : > { %p842_p3 = scmp.ne.s32.totalorder %s1196_s23, %s841_s27  ;;  %s845_s6 = sshll.u32 %s1021_s4, 4  ;;  %s846_s6 = int_to_ptr.vmem [resolvable:$false] %s845_s6 }
  0x4c   : > { %s847_s12 = scalar_lea.vmem %s846_s6, 2048  ;;  %p848_p4 = scmp.lt.s32.totalorder %s1196_s23, %s846_s6 }
  0x4d   : > { %p843_p6 = pnand %p842_p3, %p1142_p12  ;;  %p849_p13 = scmp.lt.s32.totalorder %s847_s12, %s841_s27 }
  0x4f   : > { %p844_p5 = pneg %p843_p6  ;;  %p850_p9 = por %p849_p13, %p848_p4 }
  0x51   : > { %p851_p10 = pnand %p850_p9, %p844_p5 }
  0x53   : > { %854 = shalt.err (!%p851_p10)
}
  0x54   : > { %s1022_s7 = smov 64   ;;  %s1023_s24 = smov 4  }
  0x55   : > { %704 = dma.hbm_to_vmem [thread:$0]  (%p1142_p12), %s1194_s20, 1024, %s1196_s23, %s1198_s26, %s1022_s7, %s1022_s7, %s1023_s24  }
  0x56 PF: > { %p643_p8 = scmp.ge.s32.totalorder %s1013_s22, 1  ;;  %p229_p11 = scmp.lt.s32.totalorder %s1013_s22, 9 }
  0x58   : > { %p230_p0 = pnand %p643_p8, %p229_p11 }
  0x59   : > { %s235_s17 = sand.u32 (!%p230_p0), 1, %s989_s16  }
  0x5a   : > { %233 = sbr.rel (%p230_p0) target bundleno = 454 (0x1c6), region = 28  ;;  %s644_s28 = sshll.u32 (!%p230_p0), %s235_s17, 5 }
  0x5b   : > { %s236_s29 = scalar_lea.sflag (!%p230_p0), [#allocation3], %s235_s17  ;;  %s239_s10 = scalar_lea.vmem (!%p230_p0), [#allocation2], %s644_s28 }
  0x61   : > { %956 = dma.done.wait (%p1130_p7), %s236_s29, 512  }
  0x62   : > { %958 = vsyncadd (%p1130_p7), %s236_s29, 4294966784  ;;  %s1230_s20 = sand.u32 1, %s977_s13   ;;  %p1383_p12 = scmp.ne.s32.totalorder %s1378_s11, 0 }
  0x63   : > { %s645_s8 = sshll.u32 %s1230_s20, 6  ;;  %s245_s23 = scalar_lea.sflag [#allocation6], %s1230_s20 }
  0x64   : > { %s1234_s26 = scalar_lea.vmem [#allocation5], %s645_s8 }
  0x65   : > { %960 = dma.done.wait (%p1383_p12), %s245_s23, 1024  }
  0x66   : > { %962 = vsyncadd (%p1383_p12), %s245_s23, 4294966272  ;;  %s646_s30 = sshll.u32 %s1230_s20, 1  ;;  %v284_v0 = vld [vmem:[%s239_s10] sm:$0xff]  ;;  %v285_v1 = vld [vmem:[%s239_s10 + $0x8] sm:$0xff]  ;;  %p648_p7 = scmp.ne.s32.totalorder %s997_s18, 0 }
  0x67   : > { %v286_v2 = vld [vmem:[%s239_s10 + $0x10] sm:$0xff]  ;;  %v287_v3 = vld [vmem:[%s239_s10 + $0x18] sm:$0xff]  ;;  %v288_v4 = vadd.f32 %v285_v1, %v284_v0  ;;  %s1241_s5 = scalar_lea.vmem [#allocation7], %s646_s30  ;;  %s1243_s11 = scalar_lea.vmem [#allocation8], %s646_s30  ;;  %vm308_vm0 = vcmask (!%p648_p7), 1041409  }
  0x68   : > { %v295_v5 = vadd.f32 %v287_v3, %v286_v2 }
  0x69   : > { %v289_v6 = vrot.slane %v288_v4, 4 }
  0x6a   : > { %v296_v7 = vrot.slane %v295_v5, 4 }
  0x6b   : > { %v290_v8 = vadd.f32 %v289_v6, %v288_v4 }
  0x6c   : > { %v297_v9 = vadd.f32 %v296_v7, %v295_v5 }
  0x6d   : > { %v291_v10 = vrot.slane %v290_v8, 2 }
  0x6e   : > { %v298_v11 = vrot.slane %v297_v9, 2  ;;  %305 = sbr.rel (%p648_p7) target bundleno = 120 (0x78), region = 40 }
  0x6f   : > { %v292_v12 = vadd.f32 %v291_v10, %v290_v8 }
  0x70   : > { %v299_v13 = vadd.f32 %v298_v11, %v297_v9 }
  0x71   : > { %v293_v14 = vrot.slane %v292_v12, 1 }
  0x72   : > { %v300_v15 = vrot.slane %v299_v13, 1 }
  0x73   : > { %v294_v16 = vadd.f32 %v293_v14, %v292_v12 }
  0x74   : > { %v301_v17 = vadd.f32 %v300_v15, %v299_v13 }
  0x76   : > { %v309_v18 = vsel %vm308_vm0, %v301_v17, %v294_v16 }
  0x77   : > { %311 = vst [vmem:[%s1241_s5] sm:$0x3] %v309_v18 }
  0x78 PF: > { %p649_p13 = scmp.le.s32.totalorder %s997_s18, 0 }
  0x79   : > { %vm319_vm1 = vcmask (!%p649_p13), 1041409  }
  0x7a   : > { %315 = sbr.rel (%p649_p13) target bundleno = 130 (0x82), region = 44  ;;  %v320_v20 = vsel (!%p649_p13), %vm319_vm1, %v301_v17, %v294_v16 }
  0x7e   : > { %v316_v19 = vld [vmem:[%s1241_s5] sm:$0x3] (!%p649_p13) }
  0x7f   : > { %v322_v21 = vadd.f32 (!%p649_p13), %v320_v20, %v316_v19 }
  0x81   : > { %323 = vst [vmem:[%s1241_s5] sm:$0x3] %v322_v21 }
  0x82 PF: > { %p650_p4 = scmp.ne.s32.totalorder %s997_s18, 3 }
  0x83   : > { %v817_v22 = vld [vmem:[%s1234_s26] sm:$0xff] (!%p650_p4)   ;;  %v1024_v23 = vmov (!%p650_p4), 0.0   ;;  %v818_v24 = vld [vmem:[%s1234_s26 + $0x8] sm:$0xff] (!%p650_p4)   ;;  %vm1025_vm2 = vmmov (!%p650_p4), 0   ;;  %v819_v25 = vld [vmem:[%s1234_s26 + $0x10] sm:$0xff] (!%p650_p4)   ;;  %vm331_vm3 = vcmask (!%p650_p4), 1041408  }
  0x84   : > { %327 = sbr.rel (%p650_p4) target bundleno = 405 (0x195), region = 48  ;;  %676 = vmatprep.subr.bf16.mxu0 (!%p650_p4), %v1024_v23  ;;  %692 = vmatprep.mubr.msk.bf16.mxu0 (!%p650_p4), %vm1025_vm2, %v1024_v23  ;;  %v820_v28 = vld [vmem:[%s1234_s26 + $0x18] sm:$0xff] (!%p650_p4)   ;;  %v821_v31 = vld [vmem:[%s1234_s26 + $0x20] sm:$0xff] (!%p650_p4)   ;;  %v822_v34 = vld [vmem:[%s1234_s26 + $0x28] sm:$0xff] (!%p650_p4)  }
  0x85   : > { %677 = vmatpush3.bf16.msra.mxu0 (!%p650_p4), %v817_v22  ;;  %v823_v37 = vld [vmem:[%s1234_s26 + $0x30] sm:$0xff] (!%p650_p4)   ;;  %v824_v40 = vld [vmem:[%s1234_s26 + $0x38] sm:$0xff] (!%p650_p4)  }
  0x86   : > { %678 = vmatprep.subr.bf16.mxu0 (!%p650_p4), %v1024_v23 }
  0x88   : > { %v328_v26 = vld [vmem:[%s1241_s5] sm:$0x3] (!%p650_p4) }
  0x89   : > { %679 = vmatpush3.bf16.msra.mxu0 (!%p650_p4), %v818_v24  ;;  %v329_v27 = vmul.f32 (!%p650_p4), 0.015625, %v328_v26 }
  0x8a   : > { %680 = vmatprep.subr.bf16.mxu0 (!%p650_p4), %v1024_v23 }
  0x8b   : > { %330 = vst [vmem:[%s1241_s5] sm:$0x3] %v329_v27  ;;  %v332_v29 = vsel %vm331_vm3, %v329_v27, 0.0 }
  0x8c   : > { %v333_v30 = vrot.slane %v332_v29, 4 }
  0x8d   : > { %681 = vmatpush3.bf16.msra.mxu0 %v819_v25 }
  0x8e   : > { %682 = vmatprep.subr.bf16.mxu0 %v1024_v23  ;;  %v334_v32 = vadd.f32 %v333_v30, %v332_v29 }
  0x90   : > { %v335_v33 = vrot.slane %v334_v32, 2 }
  0x91   : > { %683 = vmatpush3.bf16.msra.mxu0 %v820_v28 }
  0x92   : > { %684 = vmatprep.subr.bf16.mxu0 %v1024_v23  ;;  %v336_v35 = vadd.f32 %v335_v33, %v334_v32 }
  0x94   : > { %v337_v36 = vrot.slane %v336_v35, 1 }
  0x95   : > { %685 = vmatpush3.bf16.msra.mxu0 %v821_v31 }
  0x96   : > { %686 = vmatprep.subr.bf16.mxu0 %v1024_v23  ;;  %v338_v38 = vadd.f32 %v337_v36, %v336_v35 }
  0x98   : > { %v340_v39 = vmul.f32 0.5, %v338_v38 }
  0x99   : > { %687 = vmatpush3.bf16.msra.mxu0 %v822_v34 }
  0x9a   : > { %688 = vmatprep.subr.bf16.mxu0 %v1024_v23  ;;  %v341_v41 = vsub.f32 %v329_v27, %v340_v39 }
  0x9c   : > { %v342_v42 = vmul.f32 %v341_v41, %v341_v41 }
  0x9d   : > { %689 = vmatpush3.bf16.msra.mxu0 %v823_v37 }
  0x9e   : > { %690 = vmatprep.subr.bf16.mxu0 %v1024_v23  ;;  %v343_v43 = vsel %vm331_vm3, %v342_v42, 0.0 }
  0x9f   : > { %v344_v44 = vrot.slane %v343_v43, 4 }
  0xa1   : > { %691 = vmatpush3.bf16.msra.mxu0 %v824_v40  ;;  %v345_v45 = vadd.f32 %v344_v44, %v343_v43 }
  0xa3   : > { %v346_v46 = vrot.slane %v345_v45, 2 }
  0xa5   : > { %v347_v47 = vadd.f32 %v346_v46, %v345_v45 }
  0xa7   : > { %v348_v48 = vrot.slane %v347_v47, 1 }
  0xa9   : > { %v349_v49 = vadd.f32 %v348_v48, %v347_v47 }
  0xab   : > { %v350_v50 = vmul.f32 0.5, %v349_v49 }
  0xad   : > { %v351_v51 = vadd.f32 1e-05, %v350_v50 }
  0xaf   : > { %825 = vrsqrt.f32 %v351_v51 }
  0xb9   : > { %v826_v52 = vpop.eup %825 }
  0xba   : > { %v353_v53 = vmul.f32 %v826_v52, %v341_v41 }
  0xbc   : > { %v354_v54 = vpack.c.bf16 %v353_v53, %v353_v53 }
  0xbe   : > { %693 = vmatmul.mubr.bf16.vlgmr.msra.gmra.mrb[0].mxu0 %v354_v54 }
 0x191   : > { %v453_v55 = vpop.f32.mrb[0].mxu0 }
 0x192   : > { %459 = vst [vmem:[%s1243_s11] sm:$0x3] %v453_v55  ;;  %v694_v56 = vpop.f32.mrb[1].mxu0 }
 0x193   : > { %v456_v57 = vpop.f32.mrb[2].mxu0 }
 0x194   : > { %v695_v58 = vpop.f32.mrb[3].mxu0 }
 0x195 PF: > { %s661_s18 = sshll.u32 %s1001_s19, 5  ;;  %s479_s27 = sshll.u32 %s1241_s5, 4  ;;  %s480_s27 = int_to_ptr.vmem [resolvable:$true] %s479_s27 }
 0x196   : > { %s1270_s9 = scalar_lea.hbm %s1356_s2, %s661_s18  ;;  %s461_s4 = scalar_lea.sflag [#allocation4], %s1230_s20 }
 0x197   : > { %s855_s6 = scalar_lea.vmem %s480_s27, 32  ;;  %p1384_p1 = scmp.ne.s32.totalorder %s1379_s15, 0 }
 0x198   : > { %p856_p5 = scmp.ne.s32.totalorder %s480_s27, %s855_s6  ;;  %s1026_s12 = smov [#allocation7]  }
 0x199   : > { %s859_s7 = sshll.u32 %s1026_s12, 4  ;;  %s860_s7 = int_to_ptr.vmem [resolvable:$false] %s859_s7 }
 0x19a   : > { %p857_p2 = pnand %p856_p5, %p1384_p1  ;;  %s861_s24 = scalar_lea.vmem %s860_s7, 64 }
 0x19b   : > { %p862_p6 = scmp.lt.s32.totalorder %s480_s27, %s860_s7  ;;  %p863_p9 = scmp.lt.s32.totalorder %s861_s24, %s855_s6 }
 0x19c   : > { %p858_p3 = pneg %p857_p2 }
 0x19d   : > { %p864_p10 = por %p863_p9, %p862_p6 }
 0x19f   : > { %p865_p8 = pnand %p864_p10, %p858_p3 }
 0x1a1   : > { %868 = shalt.err (!%p865_p8)
}
 0x1a2   : > { %s869_s17 = scalar_lea.hbm %s1270_s9, 32  ;;  %s873_s10 = scalar_lea.hbm %s1356_s2, 64 }
 0x1a3   : > { %p870_p11 = scmp.ne.s32.totalorder %s1270_s9, %s869_s17  ;;  %p874_p7 = scmp.lt.u32.totalorder %s1270_s9, %s1356_s2 }
 0x1a4   : > { %p875_p13 = scmp.lt.u32.totalorder %s873_s10, %s869_s17  ;;  %p877_p5 = scmp.lt.u32.totalorder %s869_s17, %s1270_s9 }
 0x1a5   : > { %p871_p0 = pnand %p870_p11, %p1384_p1 }
 0x1a6   : > { %p876_p4 = por %p875_p13, %p874_p7 }
 0x1a7   : > { %p872_p12 = pneg %p871_p0 }
 0x1a8   : > { %p878_p2 = por %p877_p5, %p876_p4 }
 0x1aa   : > { %p879_p3 = pnand %p878_p2, %p872_p12 }
 0x1ac   : > { %882 = shalt.err (!%p879_p3)
}
 0x1ad   : > { %707 = dma.vmem_to_hbm [thread:$0]  (%p1384_p1), %s480_s27, 32, %s1270_s9, %s461_s4  }
 0x1ae   : > { %s1296_s5 = scalar_lea.hbm %s1357_s3, %s661_s18  ;;  %s492_s0 = sshll.u32 %s1243_s11, 4  ;;  %s493_s0 = int_to_ptr.vmem [resolvable:$true] %s492_s0 }
 0x1af   : > { %s466_s25 = scalar_lea.sflag [#allocation9], %s1230_s20  ;;  %s883_s6 = scalar_lea.vmem %s493_s0, 32 }
 0x1b0   : > { %p884_p6 = scmp.ne.s32.totalorder %s493_s0, %s883_s6  ;;  %s1027_s12 = smov [#allocation8]  }
 0x1b1   : > { %s887_s7 = sshll.u32 %s1027_s12, 4  ;;  %s888_s7 = int_to_ptr.vmem [resolvable:$false] %s887_s7 }
 0x1b2   : > { %p885_p9 = pnand %p884_p6, %p1384_p1  ;;  %s889_s24 = scalar_lea.vmem %s888_s7, 64 }
 0x1b3   : > { %p890_p8 = scmp.lt.s32.totalorder %s493_s0, %s888_s7  ;;  %p891_p11 = scmp.lt.s32.totalorder %s889_s24, %s883_s6 }
 0x1b4   : > { %p886_p10 = pneg %p885_p9 }
 0x1b5   : > { %p892_p0 = por %p891_p11, %p890_p8 }
 0x1b7   : > { %p893_p12 = pnand %p892_p0, %p886_p10 }
 0x1b9   : > { %896 = shalt.err (!%p893_p12)
}
 0x1ba   : > { %s897_s19 = scalar_lea.hbm %s1296_s5, 32  ;;  %s901_s18 = scalar_lea.hbm %s1357_s3, 64 }
 0x1bb   : > { %p898_p7 = scmp.ne.s32.totalorder %s1296_s5, %s897_s19  ;;  %p902_p5 = scmp.lt.u32.totalorder %s1296_s5, %s1357_s3 }
 0x1bc   : > { %p903_p2 = scmp.lt.u32.totalorder %s901_s18, %s897_s19  ;;  %p905_p6 = scmp.lt.u32.totalorder %s897_s19, %s1296_s5 }
 0x1bd   : > { %p899_p13 = pnand %p898_p7, %p1384_p1 }
 0x1be   : > { %p904_p3 = por %p903_p2, %p902_p5 }
 0x1bf   : > { %p900_p4 = pneg %p899_p13 }
 0x1c0   : > { %p906_p9 = por %p905_p6, %p904_p3 }
 0x1c2   : > { %p907_p10 = pnand %p906_p9, %p900_p4 }
 0x1c4   : > { %910 = shalt.err (!%p907_p10)
}
 0x1c5   : > { %708 = dma.vmem_to_hbm [thread:$0]  (%p1384_p1), %s493_s0, 32, %s1296_s5, %s466_s25  }
 0x1c6 PF: > { %s1385_s4 = sld [smem:[#allocation17_spill]]  ;;  %s1386_s17 = sld [smem:[#allocation24_spill]] }
 0x1c7   : > { %p718_p8 = scmp.ge.s32.totalorder %s1013_s22, 2 }
 0x1cc   : > { %s504_s28 = sand.u32 1, %s1385_s4   ;;  %p1387_p11 = scmp.ne.s32.totalorder %s1386_s17, 0 }
 0x1cd   : > { %s505_s29 = scalar_lea.sflag [#allocation4], %s504_s28 }
 0x1ce   : > { %p712_p0 = pnand %p718_p8, %p1387_p11 }
 0x1d0   : > { %964 = dma.done.wait (!%p712_p0), %s505_s29, 32  }
 0x1d1   : > { %966 = vsyncadd (!%p712_p0), %s505_s29, 4294967264  ;;  %s514_s10 = scalar_lea.sflag [#allocation9], %s504_s28 }
 0x1d2   : > { %968 = dma.done.wait (!%p712_p0), %s514_s10, 32  }
 0x1d3   : > { %970 = vsyncadd (!%p712_p0), %s514_s10, 4294967264  ;;  %s26_s22 = sadd.s32 1, %s1013_s22   ;;  %s1388_s15 = sld [smem:[#allocation22_spill]] }
 0x1d4   : > { %p23_p12 = scmp.ge.s32.totalorder %s26_s22, 10   ;;  %s1389_s8 = sld [smem:[#allocation18_spill]] }
 0x1d5   : > { %s1390_s17 = sld [smem:[#allocation23_spill]]  ;;  %s1391_s18 = sld [smem:[#allocation19_spill]] }
 0x1d6   : > { %s1392_s20 = sld [smem:[#allocation20_spill]]  ;;  %s1393_s23 = sld [smem:[#allocation21_spill]] }
 0x1d7   : > { %s1394_s12 = smov %s977_s13  ;;  %s1395_s13 = smov %s981_s14 }
 0x1d8   : > { %s1399_s19 = smov %s1009_s21  ;;  %25 = sbr.rel (!%p23_p12) target bundleno = 15 (0xf), region = 120 }
 0x1d9   : > { %s1396_s14 = smov %s1388_s15  ;;  %s1397_s15 = smov %s989_s16 }
 0x1da   : > { %s1398_s16 = smov %s1389_s8 }
 0x1dc   : > { %s1400_s21 = smov %s1393_s23 }
 0x1df   :  { %519 = vsyncpa [#allocation3], 1 }
 0x1e0   :  { %521 = vsyncpa [#allocation3 + $0x1], 1 }
 0x1e1   :  { %522 = vsyncpa [#allocation6], 1 }
 0x1e2   :  { %524 = vsyncpa [#allocation6 + $0x1], 1 }
 0x1e3   :  { %525 = vsyncpa [#allocation4], 1 }
 0x1e4   :  { %527 = vsyncpa [#allocation4 + $0x1], 1 }
 0x1e5   :  { %528 = vsyncpa [#allocation9], 1 }
 0x1e6   :  { %530 = vsyncpa [#allocation9 + $0x1], 1 }

</bundles_post_ra>
